<compile_context>
chip_gen: v6e
topology: v6e:2x2x1
jax: 0.10.0
libtpu: 0.0.40
codegen_flags: <defaults>
</compile_context>

<pallas_src>
import jax
import jax.numpy as jnp
from jax.experimental import pallas as pl
from jax.experimental.pallas import tpu as pltpu


def gkan_kernel(x_ref, w_ref, b_ref, o_ref, act_ref):
    """Computes one (TB, TO) output tile.

    x_ref:   (TB, F)    f32 input tile (constant across the j axis)
    w_ref:   (3F, TO)   pre-transposed weight tile (MXU dtype)
    b_ref:   (1, TO)    f32 bias tile
    o_ref:   (TB, TO)   output tile
    act_ref: (TB, 3F)   VMEM scratch: [sin(x) | sin(2x) | sin(3x)],
                        computed once per batch tile, reused for all j.
    """
    F = x_ref.shape[1]

    @pl.when(pl.program_id(1) == 0)
    def _compute_activations():
        x = x_ref[...]
        s = jnp.sin(x)
        c = jnp.cos(x)
        # Trig identities: sin(2x) = 2*s*c ; sin(3x) = s*(3 - 4*s^2)
        act_ref[:, 0:F] = s.astype(act_ref.dtype)
        act_ref[:, F:2 * F] = (2.0 * s * c).astype(act_ref.dtype)
        act_ref[:, 2 * F:3 * F] = (s * (3.0 - 4.0 * s * s)).astype(act_ref.dtype)

    acc = jnp.dot(act_ref[...], w_ref[...], preferred_element_type=jnp.float32)
    o_ref[...] = (acc + b_ref[...]).astype(o_ref.dtype)


def gkan_layer(x, w, b, *, tb=512, to=256, mxu_dtype=jnp.bfloat16):
    """GKANLayer forward.

    x: (B, F) f32;  w: (O, 3F) torch nn.Linear layout;  b: (O,).
    Returns (B, O) in x.dtype.  mxu_dtype=jnp.float32 gives a strict-accuracy
    path; the default bf16 path uses the fast MXU with f32 accumulation.
    """
    B, F = x.shape
    O = w.shape[0]
    assert w.shape == (O, 3 * F)

    TB = min(tb, B)
    TO = min(to, O)
    grid = (pl.cdiv(B, TB), pl.cdiv(O, TO))

    # One-time layout/dtype prep (amortized over all batch tiles):
    #   (O, 3F) -> (3F, O) so the kernel runs a plain NN matmul (no per-step
    #   weight-tile transposes), cast to the MXU dtype (halves weight DMA).
    w_t = w.T.astype(mxu_dtype)
    b2 = b.reshape(1, O).astype(jnp.float32)

    itemsize = jnp.dtype(mxu_dtype).itemsize
    vmem_need = (
        2 * TB * F * 4                   # x tiles (double-buffered, f32)
        + 2 * 3 * F * TO * itemsize      # weight tiles (double-buffered)
        + 2 * TB * TO * 4                # output tiles (double-buffered)
        + 2 * TO * 4                     # bias tiles
        + TB * 3 * F * itemsize          # activation scratch
    )
    vmem_limit = int(min(max(2 * vmem_need, 32 * 1024 * 1024), 128 * 1024 * 1024))

    cost = pl.CostEstimate(
        flops=2 * B * O * 3 * F,
        transcendentals=2 * B * F,   # sin + cos once per element of x
        bytes_accessed=int(x.size * 4 + grid[0] * O * 3 * F * itemsize + B * O * 4),
    )

    return pl.pallas_call(
        gkan_kernel,
        out_shape=jax.ShapeDtypeStruct((B, O), x.dtype),
        grid_spec=pltpu.PrefetchScalarGridSpec(
            num_scalar_prefetch=0,
            grid=grid,
            in_specs=[
                pl.BlockSpec((TB, F), lambda i, j: (i, 0)),        # x (reused over j)
                pl.BlockSpec((3 * F, TO), lambda i, j: (0, j)),    # W^T tile
                pl.BlockSpec((1, TO), lambda i, j: (0, j)),        # bias tile
            ],
            out_specs=pl.BlockSpec((TB, TO), lambda i, j: (i, j)),
            scratch_shapes=[pltpu.VMEM((TB, 3 * F), mxu_dtype)],
        ),
        compiler_params=pltpu.CompilerParams(
            dimension_semantics=("parallel", "arbitrary"),
            vmem_limit_bytes=vmem_limit,
        ),
        cost_estimate=cost,
    )(x, w_t, b2)


def make_params(key, in_features, out_features):
    k_w, k_b = jax.random.split(key)
    fan_in = in_features * 3
    bound = 1.0 / jnp.sqrt(fan_in)
    # Deterministic init matching nn.Linear's uniform(-1/sqrt(fan_in), ...)
    w = jax.random.uniform(k_w, (out_features, fan_in), jnp.float32, -bound, bound)
    b = jax.random.uniform(k_b, (out_features,), jnp.float32, -bound, bound)
    return w, b


if __name__ == "__main__":
    B, IN_F, OUT_F = 8, 16, 32

    key = jax.random.PRNGKey(0)
    k_x, k_p = jax.random.split(key)
    x = jax.random.normal(k_x, (B, IN_F), jnp.float32)
    w, b = make_params(k_p, IN_F, OUT_F)

    # Pure-JAX reference matching torch: sin(omega * x.repeat(1,3)) @ W.T + b
    omega = jnp.repeat(jnp.array([1.0, 2.0, 3.0], jnp.float32), IN_F).reshape(1, 3 * IN_F)
    xrep = jnp.concatenate([x, x, x], axis=1)
    ref = jnp.sin(omega * xrep) @ w.T + b

    # Strict-accuracy path (f32 MXU operands): matches torch/f32 to 1e-5.
    out_f32 = jax.block_until_ready(gkan_layer(x, w, b, mxu_dtype=jnp.float32))
    assert out_f32.shape == (B, OUT_F)
    assert jnp.allclose(out_f32, ref, atol=1e-5, rtol=1e-5)

    # Default perf path (bf16 MXU operands, f32 accumulate): looser tolerance.
    out_bf16 = jax.block_until_ready(gkan_layer(x, w, b))
    assert out_bf16.shape == (B, OUT_F)
    assert jnp.allclose(out_bf16, ref, atol=5e-2, rtol=0)

    print("KERNEL_OK")
</pallas_src>

<mosaic_0001>
module attributes {stable_mosaic.version = 11 : i64} {
  func.func @gkan_kernel(%arg0: i32, %arg1: i32, %arg2: memref<8x16xf32, #tpu.memory_space<vmem>>, %arg3: memref<48x32xf32, #tpu.memory_space<vmem>>, %arg4: memref<1x32xf32, #tpu.memory_space<vmem>>, %arg5: memref<8x32xf32, #tpu.memory_space<vmem>>, %arg6: memref<8x48xf32, #tpu.memory_space<vmem>>) attributes {dimension_semantics = [#tpu.dimension_semantics<parallel>, #tpu.dimension_semantics<arbitrary>], iteration_bounds = array<i64: 1, 1>, scalar_prefetch = 0 : i64, scratch_operands = 1 : i64, tpu.core_type = #tpu.core_type<tc>, window_params = [{transform_indices = @transform_0, window_bounds = array<i64: 8, 16>}, {transform_indices = @transform_1, window_bounds = array<i64: 48, 32>}, {transform_indices = @transform_2, window_bounds = array<i64: 1, 32>}, {transform_indices = @transform_3, window_bounds = array<i64: 8, 32>}]} {
    %c0_i32 = arith.constant 0 : i32
    %0 = arith.cmpi eq, %arg1, %c0_i32 : i32
    %1 = arith.extui %0 : i1 to i32
    %c0_i32_0 = arith.constant 0 : i32
    %2 = arith.cmpi ne, %1, %c0_i32_0 : i32
    scf.if %2 {
      %c0_8 = arith.constant 0 : index
      %c0_9 = arith.constant 0 : index
      %10 = vector.load %arg2[%c0_8, %c0_9] : memref<8x16xf32, #tpu.memory_space<vmem>>, vector<8x16xf32>
      %11 = math.sin %10 : vector<8x16xf32>
      %12 = math.cos %10 : vector<8x16xf32>
      %c0_10 = arith.constant 0 : index
      %c0_11 = arith.constant 0 : index
      %13 = vector.load %arg6[%c0_10, %c0_11] : memref<8x48xf32, #tpu.memory_space<vmem>>, vector<8x16xf32>
      tpu.vector_store %arg6[%c0_10, %c0_11], %11 {strides = array<i32>} : memref<8x48xf32, #tpu.memory_space<vmem>>, vector<8x16xf32>,
      %cst_12 = arith.constant 2.000000e+00 : f32
      %14 = vector.broadcast %cst_12 : f32 to vector<8x16xf32>
      %15 = arith.mulf %14, %11 : vector<8x16xf32>
      %16 = arith.mulf %15, %12 : vector<8x16xf32>
      %c0_13 = arith.constant 0 : index
      %c16 = arith.constant 16 : index
      %17 = vector.load %arg6[%c0_13, %c16] : memref<8x48xf32, #tpu.memory_space<vmem>>, vector<8x16xf32>
      tpu.vector_store %arg6[%c0_13, %c16], %16 {strides = array<i32>} : memref<8x48xf32, #tpu.memory_space<vmem>>, vector<8x16xf32>,
      %cst_14 = arith.constant 4.000000e+00 : f32
      %18 = vector.broadcast %cst_14 : f32 to vector<8x16xf32>
      %19 = arith.mulf %18, %11 : vector<8x16xf32>
      %20 = arith.mulf %19, %11 : vector<8x16xf32>
      %cst_15 = arith.constant 3.000000e+00 : f32
      %21 = vector.broadcast %cst_15 : f32 to vector<8x16xf32>
      %22 = arith.subf %21, %20 : vector<8x16xf32>
      %23 = arith.mulf %11, %22 : vector<8x16xf32>
      %c0_16 = arith.constant 0 : index
      %c32 = arith.constant 32 : index
      %24 = vector.load %arg6[%c0_16, %c32] : memref<8x48xf32, #tpu.memory_space<vmem>>, vector<8x16xf32>
      tpu.vector_store %arg6[%c0_16, %c32], %23 {strides = array<i32>} : memref<8x48xf32, #tpu.memory_space<vmem>>, vector<8x16xf32>,
    } else {
    }
    %c0 = arith.constant 0 : index
    %c0_1 = arith.constant 0 : index
    %3 = vector.load %arg6[%c0, %c0_1] : memref<8x48xf32, #tpu.memory_space<vmem>>, vector<8x48xf32>
    %c0_2 = arith.constant 0 : index
    %c0_3 = arith.constant 0 : index
    %4 = vector.load %arg3[%c0_2, %c0_3] : memref<48x32xf32, #tpu.memory_space<vmem>>, vector<48x32xf32>
    %cst = arith.constant dense<0.000000e+00> : vector<8x32xf32>
    %5 = tpu.matmul %3, %4, %cst {dimension_numbers = #tpu.dot_dimension_numbers<[1], [0], [0], [1], [0, 0, 1, 1], [], []>} : vector<8x48xf32>, vector<48x32xf32>, vector<8x32xf32> -> vector<8x32xf32>
    %c0_4 = arith.constant 0 : index
    %c0_5 = arith.constant 0 : index
    %6 = vector.load %arg4[%c0_4, %c0_5] : memref<1x32xf32, #tpu.memory_space<vmem>>, vector<1x32xf32>
    %7 = vector.broadcast %6 : vector<1x32xf32> to vector<8x32xf32>
    %8 = arith.addf %5, %7 : vector<8x32xf32>
    %c0_6 = arith.constant 0 : index
    %c0_7 = arith.constant 0 : index
    %9 = vector.load %arg5[%c0_6, %c0_7] : memref<8x32xf32, #tpu.memory_space<vmem>>, vector<8x32xf32>
    tpu.vector_store %arg5[%c0_6, %c0_7], %8 {strides = array<i32>} : memref<8x32xf32, #tpu.memory_space<vmem>>, vector<8x32xf32>,
    return
  }
  func.func @transform_0(%arg0: i32, %arg1: i32) -> (i32, i32) {
    %c0_i32 = arith.constant 0 : i32
    %c0_i32_0 = arith.constant 0 : i32
    return %arg0, %c0_i32 : i32, i32
  }
  func.func @transform_1(%arg0: i32, %arg1: i32) -> (i32, i32) {
    %c0_i32 = arith.constant 0 : i32
    %c0_i32_0 = arith.constant 0 : i32
    return %c0_i32, %arg1 : i32, i32
  }
  func.func @transform_2(%arg0: i32, %arg1: i32) -> (i32, i32) {
    %c0_i32 = arith.constant 0 : i32
    %c0_i32_0 = arith.constant 0 : i32
    return %c0_i32, %arg1 : i32, i32
  }
  func.func @transform_3(%arg0: i32, %arg1: i32) -> (i32, i32) {
    %c0_i32 = arith.constant 0 : i32
    return %arg0, %arg1 : i32, i32
  }
}

</mosaic_0001>

<bundles_post_ra>
// kernel: tpu_custom_call.1
= control target key start
LH: loop header
LB: loop body
LE: loop exit
PB: predicated region body
PF: predicated region fallthrough
CT: control target
= control target key end

     0   :  { %s506_s0 = inlined_call_operand.vmem [shape: f32[8,16], index: 0, kind: input, shape index: {}]   ;;  %s507_s1 = inlined_call_operand.vmem [shape: f32[48,32], index: 1, kind: input, shape index: {}]   ;;  %s508_s2 = inlined_call_operand.vmem [shape: f32[1,32], index: 2, kind: input, shape index: {}]   ;;  %s509_s3 = inlined_call_operand.hbm [shape: f32[8,32], index: 3, kind: output, shape index: {}]  }
   0x1   :  { %v458_v0 = vld [vmem:[%s506_s0] sm:$0xff] }
   0x2   :  { %v23_v1 = vand.u32 2139095040, %v458_v0  ;;  %v20_v3 = vand.u32 2147483647, %v458_v0 }
   0x4   :  { %v24_v2 = vshrl.u32 %v23_v1, 23 }
   0x5   :  { %8 = vsyncpa [#allocation4], 0  ;;  %v27_v6 = vand.u32 8388607, %v20_v3  ;;  %v424_v12 = vmov 683565275   ;;  %vm112_vm15 = vweird.f32 %v458_v0 }
   0x6   :  { %v351_v4 = vadd.s32 4294967169, %v24_v2  ;;  %v425_v14 = vmov 2475754826   ;;  %v426_v16 = vmov 2131351028   ;;  %vm22_vm7 = vcmp.lt.s32.totalorder %v458_v0, 0 }
   0x7   :  { %v28_v9 = vor.u32 8388608, %v27_v6  ;;  %v427_v18 = vmov 2102212464   ;;  %v428_v20 = vmov 920167782   ;;  %s432_s25 = smov 16  }
   0x8   :  { %v30_v5 = vadd.s32 1, %v351_v4  ;;  %v429_v27 = vmov 1326507024   ;;  %vm21_vm8 = vcmp.le.f32.partialorder %v20_v3, 0.7853982  ;;  %v252_v3 = vld [vmem:[%s507_s1 + $0x20] sm:$0xff] }
   0x9   :  { %v68_v29 = vshll.u32 %v28_v9, 8  ;;  %s433_s26 = smov 32   ;;  %s434_s28 = smov [#allocation3]  }
   0xa   :  { %vm31_vm0 = vcmp.gt.s32.totalorder %v30_v5, 0  ;;  %s343_s29 = sshll.u32 %s434_s28, 4  ;;  %s344_s29 = int_to_ptr.vmem [resolvable:$true] %s343_s29 }
   0xb   :  { %v32_v7 = vsel %vm31_vm0, %v30_v5, 0  ;;  %vm431_vm0 = vmmov 0   ;;  %s402_s30 = scalar_lea.vmem %s344_s29, 128  ;;  %p407_p1 = scmp.lt.s32.totalorder %s344_s29, %s344_s29 }
   0xc   :  { %v34_v8 = vand.u32 31, %v32_v7  ;;  %v33_v10 = vshrl.u32 %v32_v7, 5  ;;  %p403_p0 = scmp.ne.s32.totalorder %s344_s29, %s402_s30  ;;  %p408_p2 = scmp.lt.s32.totalorder %s402_s30, %s402_s30 }
   0xe   :  { %v35_v11 = vsub.s32 32, %v34_v8  ;;  %v37_v13 = vshll.u32 %v424_v12, %v34_v8  ;;  %v40_v15 = vshll.u32 %v425_v14, %v34_v8  ;;  %v43_v17 = vshll.u32 %v426_v16, %v34_v8  ;;  %p409_p3 = por %p408_p2, %p407_p1 }
   0xf   :  { %v46_v19 = vshll.u32 %v427_v18, %v34_v8  ;;  %v49_v21 = vshll.u32 %v428_v20, %v34_v8  ;;  %vm52_vm1 = vcmp.lt.s32.totalorder %v33_v10, 1  ;;  %vm55_vm2 = vcmp.lt.s32.totalorder %v33_v10, 4 }
  0x10   :  { %v36_v22 = vshrl.u32 %v424_v12, %v35_v11  ;;  %v38_v23 = vshrl.u32 %v425_v14, %v35_v11  ;;  %v41_v24 = vshrl.u32 %v426_v16, %v35_v11  ;;  %v44_v25 = vshrl.u32 %v427_v18, %v35_v11  ;;  %p410_p4 = pnand %p409_p3, %p403_p0 }
  0x11   :  { %v47_v26 = vshrl.u32 %v428_v20, %v35_v11  ;;  %v50_v28 = vshrl.u32 %v429_v27, %v35_v11  ;;  %vm53_vm3 = vcmp.lt.s32.totalorder %v33_v10, 2  ;;  %vm54_vm4 = vcmp.lt.s32.totalorder %v33_v10, 3 }
  0x12   :  { %v39_v30 = vor.u32 %v38_v23, %v37_v13  ;;  %v42_v31 = vor.u32 %v41_v24, %v40_v15  ;;  %v45_v32 = vor.u32 %v44_v25, %v43_v17  ;;  %v430_v23 = vmov 0.0   ;;  %v253_v24 = vld [vmem:[%s507_s1 + $0x28] sm:$0xff] }
  0x13   :  { %v48_v33 = vor.u32 %v47_v26, %v46_v19  ;;  %v51_v34 = vor.u32 %v50_v28, %v49_v21  ;;  %368 = vmatprep.subr.mxu0 %v430_v23  ;;  %380 = vmatprep.mubr.msk.f32.mxu0 %vm431_vm0, %v430_v23 }
  0x14   :  { %v56_v35 = vsel %vm52_vm1, %v36_v22, %v39_v30  ;;  %v57_v36 = vsel %vm55_vm2, %v45_v32, 2102212464  ;;  %v60_v37 = vsel %vm52_vm1, %v39_v30, %v42_v31  ;;  %v64_v38 = vsel %vm52_vm1, %v42_v31, %v45_v32  ;;  %369 = vmatpush3.msra.mxu0 %v253_v24  ;;  %v250_v30 = vld [vmem:[%s507_s1 + $0x10] sm:$0xff] }
  0x15   :  { %v58_v39 = vsel %vm54_vm4, %v42_v31, %v57_v36  ;;  %v61_v40 = vsel %vm55_vm2, %v48_v33, 920167782  ;;  %v65_v41 = vsel %vm55_vm2, %v51_v34, 1326507024  ;;  %370 = vmatprep.subr.mxu0 %v430_v23  ;;  %vm227_vm1 = vcmask 130048  }
  0x16   :  { %v62_v42 = vsel %vm54_vm4, %v45_v32, %v61_v40  ;;  %v66_v43 = vsel %vm54_vm4, %v48_v33, %v65_v41  ;;  %v59_v44 = vsel %vm53_vm3, %v56_v35, %v58_v39  ;;  %371 = vmatpush3.msra.mxu0 %v252_v3  ;;  %v249_v35 = vld [vmem:[%s507_s1 + $0x8] sm:$0xff]  ;;  %v248_v39 = vld [vmem:[%s507_s1] sm:$0xff]  ;;  %vm235_vm2 = vcmask 261248  }
  0x17   :  { %v63_v45 = vsel %vm53_vm3, %v60_v37, %v62_v42  ;;  %v67_v46 = vsel %vm53_vm3, %v64_v38, %v66_v43  ;;  %v75_v51 = vmul.u32 %v68_v29, %v59_v44  ;;  %372 = vmatprep.subr.mxu0 %v430_v23  ;;  %vm245_vm3 = vcmask 392448  }
  0x18   :  { %v464_v47 = vmul.u32.u64.low %v68_v29, %v67_v46  ;;  %v465_v48 = vmul.u32.u64.high %v68_v29, %v67_v46, %v464_v47  ;;  %v467_v49 = vmul.u32.u64.low %v68_v29, %v63_v45  ;;  %v468_v50 = vmul.u32.u64.high %v68_v29, %v63_v45, %v467_v49  ;;  %v251_v29 = vld [vmem:[%s507_s1 + $0x18] sm:$0xff] }
  0x19   :  { %373 = vmatpush3.msra.mxu0 %v251_v29  ;;  %vm261_vm4 = vcmask 392192  }
  0x1a   :  { %vm77_vm5 = vc.u32 %v465_v48, %v467_v49  ;;  %v78_v52 = vadd.s32 1, %v468_v50  ;;  %v76_v63 = vadd.s32 %v467_v49, %v465_v48  ;;  %374 = vmatprep.subr.mxu0 %v430_v23  ;;  %v359_v49 = vld [vmem:[%s508_s2] ss:$0 sm:$0xff] }
  0x1b   :  { %375 = vmatpush3.msra.mxu0 %v250_v30 }
  0x1c   :  { %v79_v53 = vsel %vm77_vm5, %v78_v52, %v468_v50  ;;  %376 = vmatprep.subr.mxu0 %v430_v23  ;;  %vm335_vm5 = vcmask 261120  }
  0x1d   :  { %v80_v54 = vadd.s32 %v79_v53, %v75_v51  ;;  %377 = vmatpush3.msra.mxu0 %v249_v35 }
  0x1e   :  { %378 = vmatprep.subr.mxu0 %v430_v23 }
  0x1f   :  { %v81_v55 = vadd.s32 536870912, %v80_v54  ;;  %379 = vmatpush3.msra.mxu0 %v248_v39 }
  0x21   :  { %v82_v56 = vshrl.u32 %v81_v55, 30 }
  0x23   :  { %v83_v57 = vshll.u32 %v82_v56, 30  ;;  %v106_v14 = vsub.s32 4, %v82_v56 }
  0x25   :  { %v84_v58 = vsub.s32 %v80_v54, %v83_v57  ;;  %v107_v17 = vsel %vm22_vm7, %v106_v14, %v82_v56 }
  0x26   :  { %v109_v19 = vsel %vm21_vm8, 0, %v107_v17 }
  0x27   :  { %v86_v59 = vsub.s32 0, %v84_v58  ;;  %v113_v20 = vadd.s32 3, %v109_v19  ;;  %v217_v22 = vand.u32 3, %v109_v19 }
  0x29   :  { %v352_v60 = vmin.u32 %v86_v59, %v84_v58  ;;  %v114_v21 = vand.u32 3, %v113_v20  ;;  %vm222_vm10 = vcmp.eq.s32.totalorder %v217_v22, 2  ;;  %vm219_vm12 = vcmp.eq.s32.totalorder %v217_v22, 0 }
  0x2a   :  { %vm218_vm14 = vcmp.lt.s32.totalorder %v217_v22, 2 }
  0x2b   :  { %v88_v61 = vclz %v352_v60  ;;  %vm119_vm9 = vcmp.eq.s32.totalorder %v114_v21, 2  ;;  %vm116_vm11 = vcmp.eq.s32.totalorder %v114_v21, 0  ;;  %vm115_vm13 = vcmp.lt.s32.totalorder %v114_v21, 2 }
  0x2d   :  { %v353_v62 = vadd.s32 4294967294, %v88_v61 }
  0x2f   :  { %vm354_vm6 = vcmp.lt.s32.totalorder %v353_v62, 0 }
  0x30   :  { %v91_v1 = vsel %vm354_vm6, 0, %v353_v62 }
  0x31   :  { %v92_v2 = vsub.s32 32, %v91_v1  ;;  %v93_v4 = vshll.u32 %v84_v58, %v91_v1  ;;  %v96_v5 = vsub.s32 4294967266, %v91_v1 }
  0x33   :  { %v94_v6 = vshrl.u32 %v76_v63, %v92_v2  ;;  %v97_v7 = vadd.s32 127, %v96_v5 }
  0x35   :  { %v95_v8 = vor.u32 %v94_v6, %v93_v4  ;;  %v98_v9 = vshll.u32 %v97_v7, 23 }
  0x37   :  { %v99_v10 = vor.u32 4788187, %v98_v9  ;;  %v102_v11 = vcvt.s32.f32 %v95_v8 }
  0x39   :  { %v100_v12 = vand.u32 2147483647, %v99_v10 }
  0x3b   :  { %v103_v13 = vmul.f32 %v102_v11, %v100_v12 }
  0x3d   :  { %v104_v15 = vxor.u32 2147483648, %v103_v13 }
  0x3f   :  { %v105_v16 = vsel %vm22_vm7, %v104_v15, %v103_v13 }
  0x40   :  { %v108_v18 = vsel %vm21_vm8, %v458_v0, %v105_v16 }
  0x41   :  { %398 = vcosq.f32 %v108_v18 }
  0x42   :  { %400 = vsinq.f32 %v108_v18 }
  0x4e   :  { %v399_v25 = vpop.eup %398 }
  0x4f   :  { %v401_v26 = vpop.eup %400  ;;  %v120_v27 = vxor.u32 2147483648, %v399_v25 }
  0x50   :  { %v117_v28 = vxor.u32 2147483648, %v401_v26 }
  0x51   :  { %v121_v31 = vsel %vm119_vm9, %v120_v27, %v401_v26  ;;  %v224_v32 = vsel %vm222_vm10, %v120_v27, %v401_v26 }
  0x52   :  { %v118_v33 = vsel %vm116_vm11, %v399_v25, %v117_v28  ;;  %v221_v34 = vsel %vm219_vm12, %v399_v25, %v117_v28 }
  0x53   :  { %v122_v36 = vsel %vm115_vm13, %v118_v33, %v121_v31  ;;  %v225_v37 = vsel %vm218_vm14, %v221_v34, %v224_v32 }
  0x54   :  { %v123_v0 = vsel %vm112_vm15, nan, %v122_v36  ;;  %v226_v38 = vsel %vm112_vm15, nan, %v225_v37 }
  0x55   :  { %v229_v40 = vmul.f32 2.0, %v123_v0  ;;  %v237_v41 = vmul.f32 4.0, %v123_v0  ;;  %228 = vst.msk [vmem:[#allocation2] sm:$0xff] %vm227_vm1, %v123_v0 }
  0x57   :  { %v230_v42 = vmul.f32 %v229_v40, %v226_v38  ;;  %v238_v43 = vmul.f32 %v237_v41, %v123_v0 }
  0x59   :  { %232 = vrot.lane.b32.xlu0 %v230_v42, %s432_s25  ;;  %v239_v44 = vsub.f32 3.0, %v238_v43 }
  0x5b   :  { %v240_v45 = vmul.f32 %v239_v44, %v123_v0 }
  0x5d   :  { %242 = vrot.lane.b32.xlu0 %v240_v45, %s433_s26 }
  0xcb   :  { %v233_v46 = vpop.permute.xlu0 %232 }
  0xcc   :  { %236 = vst.msk [vmem:[#allocation2] sm:$0xff] %vm235_vm2, %v233_v46 }
  0xcf   :  { %v243_v47 = vpop.permute.xlu0 %242 }
  0xd0   :  { %246 = vst.msk [vmem:[#allocation2] sm:$0xff] %vm245_vm3, %v243_v47 }
  0xd7   :  { %v247_v48 = vld [vmem:[#allocation2] sm:$0xff] }
  0xd8   :  { %381 = vmatmul.mubr.msk.f32.vlgmr.msra.gmra.mxu0 %vm261_vm4, %v247_v48 }
 0x198   :  { %v331_v50 = vpop.f32.mrf.mxu0 }
 0x199   :  { %v332_v51 = vadd.f32 %v359_v49, %v331_v50 }
 0x19a   :  { %v382_v52 = vpop.f32.mrf.mxu0 }
 0x19b   :  { %336 = vst.msk [vmem:[#allocation3] sm:$0xff] %vm335_vm5, %v332_v51 }
 0x19c   :  { %413 = shalt.err (!%p410_p4)
}
 0x19d   :  { %346 = dma.vmem_to_hbm [thread:$0]  %s344_s29, 128, %s509_s3, [#allocation4]  }
 0x19e   :  { %422 = dma.done.wait [#allocation4], 128  }
 0x19f   :  { %423 = vsyncadd [#allocation4], 4294967168 }
 0x1a0   :  { %350 = vsyncpa [#allocation4], 1 }

</bundles_post_ra>
